<compile_context>
chip_gen: v7x
topology: tpu7x:2x2x1
jax: 0.10.0
libtpu: 0.0.40
codegen_flags: <defaults>
</compile_context>

<pallas_src>
import jax
import jax.numpy as jnp
from jax.experimental import pallas as pl
from jax.experimental.pallas import tpu as pltpu

NEG_SLOPE = 0.01  # PyTorch nn.LeakyReLU default
LANE = 128


def _round_up(n, m):
    return ((n + m - 1) // m) * m


def _cdiv(a, b):
    return -(-a // b)


def _equinn_kernel(x_ref, fl_ref, eq_ref, wend_ref, bend_ref, o_ref):
    # x_ref:    (TR, DL)    lane-packed input tile (P batch rows per vreg row)
    # fl_ref:   (1, DL)     first_layer parameter (lane-tiled)
    # eq_ref:   (L*5, DL)   FOLDED equi weights, 5 rows per layer:
    #                       [coef_max, coef_min, coef_t, coef_tanh, const]
    # wend_ref: (DL, NOUT)  block-diagonal end Linear weight
    # bend_ref: (1, NOUT)   lane-tiled end Linear bias
    # o_ref:    (TR, NOUT)  output tile (full-extent last dim)
    out = x_ref[...] * fl_ref[...]                     # (TR, DL)

    n_layers = eq_ref.shape[0] // 5
    for l in range(n_layers):                          # static unroll, L is small
        base = 5 * l
        w_max = eq_ref[base + 0:base + 1, :]           # (1, DL) rows off the ref
        w_min = eq_ref[base + 1:base + 2, :]
        w_t = eq_ref[base + 2:base + 3, :]
        w_th = eq_ref[base + 3:base + 4, :]
        w_c = eq_ref[base + 4:base + 5, :]

        pos = jnp.maximum(out, 0.0)                    # max(x, 0)
        neg = jnp.minimum(out, 0.0)                    # min(x, 0)
        t = jnp.tanh(0.5 * out)                        # single EUP tanh per layer
        # tanh(out) = 2*t / (1 + t*t)   (double-angle identity, exact)
        t_full = (2.0 * t) * pl.reciprocal(1.0 + t * t, approx=False)

        out = (w_max * pos + w_min * neg + w_t * t + w_th * t_full + w_c)

    # end_model: block-diagonal Linear on the MXU, bias add, store.
    o_ref[...] = (
        jnp.dot(out, wend_ref[...], preferred_element_type=jnp.float32)
        + bend_ref[...]
    ).astype(o_ref.dtype)


def equinn_norm_forward(x, first_layer, equi_weights, end_w, end_b, *, tile_rows=None):
    """x: (B, D); first_layer: (1, D); equi_weights: (L, 5, D) in
    [relu, leaky, sigmoid, tanh, identity] order; end_w: (D, Dout); end_b: (1, Dout)."""
    B, D = x.shape
    Dout = end_w.shape[1]
    L = equi_weights.shape[0]

    # ---- fold the activation weights (exact algebra) --------------------------------
    w0 = equi_weights[:, 0, :]   # ReLU
    w1 = equi_weights[:, 1, :]   # LeakyReLU
    w2 = equi_weights[:, 2, :]   # Sigmoid
    w3 = equi_weights[:, 3, :]   # Tanh
    w4 = equi_weights[:, 4, :]   # Identity
    folded = jnp.stack(
        [
            w0 + w1 + w4,            # coefficient on max(x, 0)
            NEG_SLOPE * w1 + w4,     # coefficient on min(x, 0)
            0.5 * w2,                # coefficient on t = tanh(0.5*x)  (sigmoid part)
            w3,                      # coefficient on tanh(x) = 2t/(1+t^2)
            0.5 * w2,                # additive constant (from sigmoid)
        ],
        axis=1,
    ).reshape(L * 5, D)

    # ---- lane packing: P batch rows per 128-lane vreg row ---------------------------
    P = LANE // D if (D <= LANE and LANE % D == 0) else 1
    DL = _round_up(P * D, LANE)      # lane width seen by the kernel
    NOUT = P * Dout                  # natural output width (full-extent last dim)

    Bp = _round_up(B, P)
    rows = Bp // P

    # ---- batch-row tiling ------------------------------------------------------------
    if tile_rows is None:
        if rows <= 8:
            tile_rows = rows                         # full-extent block, one grid step
        else:
            n_tiles = max(2, _cdiv(rows, 1024))      # >=2 tiles -> both v7x TCs busy
            tile_rows = _round_up(_cdiv(rows, n_tiles), 8)
    rows_p = _round_up(rows, tile_rows)
    num_tiles = rows_p // tile_rows

    # ---- build packed operands --------------------------------------------------------
    x_b = jnp.pad(x, ((0, Bp - B), (0, 0))) if Bp != B else x
    x_packed = x_b.reshape(rows, P * D)              # free, contiguous row-major
    if DL != P * D:
        x_packed = jnp.pad(x_packed, ((0, 0), (0, DL - P * D)))
    if rows_p != rows:
        x_packed = jnp.pad(x_packed, ((0, rows_p - rows), (0, 0)))

    def _lane_tile(a):   # (r, D) -> (r, DL): repeat P times along lanes, zero-pad tail
        a = jnp.tile(a, (1, P))
        if DL != P * D:
            a = jnp.pad(a, ((0, 0), (0, DL - P * D)))
        return a

    fl_packed = _lane_tile(first_layer)              # (1, DL)
    eq_packed = _lane_tile(folded)                   # (L*5, DL)

    # block-diagonal end weight: kron(I_P, end_w) -> (P*D, P*Dout); zero-pad extra rows
    wend = jnp.kron(jnp.eye(P, dtype=end_w.dtype), end_w)
    if DL != P * D:
        wend = jnp.pad(wend, ((0, DL - P * D), (0, 0)))
    bend = jnp.tile(end_b, (1, P))                   # (1, NOUT)

    cost = pl.CostEstimate(
        flops=int(rows_p * DL * L * 16 + 2 * rows_p * DL * NOUT),
        transcendentals=int(2 * L * rows_p * DL),    # tanh + reciprocal per element
        bytes_accessed=int(
            4 * (rows_p * DL + rows_p * NOUT + DL + L * 5 * DL + DL * NOUT + NOUT)
        ),
    )

    out_packed = pl.pallas_call(
        _equinn_kernel,
        out_shape=jax.ShapeDtypeStruct((rows_p, NOUT), jnp.float32),
        grid=(num_tiles,),
        in_specs=[
            pl.BlockSpec((tile_rows, DL), lambda i: (i, 0)),   # x: tiled over rows
            pl.BlockSpec((1, DL), lambda i: (0, 0)),           # first_layer
            pl.BlockSpec((L * 5, DL), lambda i: (0, 0)),       # folded equi weights
            pl.BlockSpec((DL, NOUT), lambda i: (0, 0)),        # block-diag end weight
            pl.BlockSpec((1, NOUT), lambda i: (0, 0)),         # end bias
        ],
        out_specs=pl.BlockSpec((tile_rows, NOUT), lambda i: (i, 0)),
        compiler_params=pltpu.CompilerParams(
            dimension_semantics=("parallel",),                 # megacore shard on v7x
        ),
        cost_estimate=cost,
    )(x_packed, fl_packed, eq_packed, wend, bend)

    # (rows_p, P*Dout) -> (rows_p*P, Dout) is a free reshape; drop padded rows.
    return out_packed.reshape(rows_p * P, Dout)[:B, :]


def equinn_norm_reference(x, first_layer, equi_weights, end_w, end_b):
    """Pure-JAX reference mirroring the PyTorch forward (unfolded activations)."""
    out = x * first_layer
    for l in range(equi_weights.shape[0]):
        w = equi_weights[l]  # (5, D)
        stacked = jnp.stack(
            [
                jnp.maximum(out, 0.0),
                jnp.where(out >= 0.0, out, NEG_SLOPE * out),
                1.0 / (1.0 + jnp.exp(-out)),
                jnp.tanh(out),
                out,
            ],
            axis=-1,
        )  # (B, D, 5)
        out = jnp.sum(stacked * w.T[None, :, :], axis=-1)
    return out @ end_w + end_b


if __name__ == "__main__":
    # Small deterministic config consistent with the module:
    #   input_dim = 32, prep_space of length 3, end_model = Linear(32 -> 16), batch = 8
    B, D, Dout, L = 8, 32, 16, 3

    key = jax.random.PRNGKey(0)
    k_x, k_fl, k_eq, k_w, k_b = jax.random.split(key, 5)

    x = jax.random.normal(k_x, (B, D), dtype=jnp.float32)

    # Parameters (torch.randn -> standard normal), deterministic in-script init.
    first_layer = jax.random.normal(k_fl, (1, D), dtype=jnp.float32)
    # torch shape per layer is (1, D, 5); pack as (L, 5, D) for lane-friendly broadcast.
    equi_weights_torch_layout = jax.random.normal(k_eq, (L, 1, D, 5), dtype=jnp.float32)
    equi_weights = jnp.transpose(equi_weights_torch_layout[:, 0, :, :], (0, 2, 1))  # (L, 5, D)
    # end_model = Linear(D, Dout): weight (Dout, D) in torch; store transposed (D, Dout).
    end_w = jax.random.normal(k_w, (Dout, D), dtype=jnp.float32).T * (1.0 / jnp.sqrt(D))
    end_b = jax.random.normal(k_b, (1, Dout), dtype=jnp.float32) * 0.01

    out = equinn_norm_forward(x, first_layer, equi_weights, end_w, end_b)
    out = jax.block_until_ready(out)

    ref = equinn_norm_reference(x, first_layer, equi_weights, end_w, end_b)
    assert out.shape == (B, Dout)
    assert jnp.allclose(out, ref, atol=1e-4, rtol=1e-4), "mismatch vs reference"

    print("KERNEL_OK")
</pallas_src>

<mosaic_0001>
module attributes {stable_mosaic.version = 11 : i64} {
  func.func @_equinn_kernel(%arg0: i32, %arg1: memref<2x128xf32, #tpu.memory_space<vmem>>, %arg2: memref<1x128xf32, #tpu.memory_space<vmem>>, %arg3: memref<15x128xf32, #tpu.memory_space<vmem>>, %arg4: memref<128x64xf32, #tpu.memory_space<vmem>>, %arg5: memref<1x64xf32, #tpu.memory_space<vmem>>, %arg6: memref<2x64xf32, #tpu.memory_space<vmem>>) attributes {dimension_semantics = [#tpu.dimension_semantics<parallel>], iteration_bounds = array<i64: 1>, scalar_prefetch = 0 : i64, scratch_operands = 0 : i64, tpu.core_type = #tpu.core_type<tc>, window_params = [{transform_indices = @transform_0, window_bounds = array<i64: 2, 128>}, {pipeline_mode = #tpu.pipeline_mode<synchronous>, transform_indices = @transform_1, window_bounds = array<i64: 1, 128>}, {pipeline_mode = #tpu.pipeline_mode<synchronous>, transform_indices = @transform_2, window_bounds = array<i64: 15, 128>}, {pipeline_mode = #tpu.pipeline_mode<synchronous>, transform_indices = @transform_3, window_bounds = array<i64: 128, 64>}, {pipeline_mode = #tpu.pipeline_mode<synchronous>, transform_indices = @transform_4, window_bounds = array<i64: 1, 64>}, {transform_indices = @transform_5, window_bounds = array<i64: 2, 64>}]} {
    %c0 = arith.constant 0 : index
    %c0_0 = arith.constant 0 : index
    %0 = vector.load %arg1[%c0, %c0_0] : memref<2x128xf32, #tpu.memory_space<vmem>>, vector<2x128xf32>
    %c0_1 = arith.constant 0 : index
    %c0_2 = arith.constant 0 : index
    %1 = vector.load %arg2[%c0_1, %c0_2] : memref<1x128xf32, #tpu.memory_space<vmem>>, vector<1x128xf32>
    %2 = vector.broadcast %1 : vector<1x128xf32> to vector<2x128xf32>
    %3 = arith.mulf %0, %2 : vector<2x128xf32>
    %c0_3 = arith.constant 0 : index
    %c0_4 = arith.constant 0 : index
    %4 = vector.load %arg3[%c0_3, %c0_4] : memref<15x128xf32, #tpu.memory_space<vmem>>, vector<1x128xf32>
    %c1 = arith.constant 1 : index
    %c0_5 = arith.constant 0 : index
    %5 = vector.load %arg3[%c1, %c0_5] : memref<15x128xf32, #tpu.memory_space<vmem>>, vector<1x128xf32>
    %c2 = arith.constant 2 : index
    %c0_6 = arith.constant 0 : index
    %6 = vector.load %arg3[%c2, %c0_6] : memref<15x128xf32, #tpu.memory_space<vmem>>, vector<1x128xf32>
    %c3 = arith.constant 3 : index
    %c0_7 = arith.constant 0 : index
    %7 = vector.load %arg3[%c3, %c0_7] : memref<15x128xf32, #tpu.memory_space<vmem>>, vector<1x128xf32>
    %c4 = arith.constant 4 : index
    %c0_8 = arith.constant 0 : index
    %8 = vector.load %arg3[%c4, %c0_8] : memref<15x128xf32, #tpu.memory_space<vmem>>, vector<1x128xf32>
    %cst = arith.constant 0.000000e+00 : f32
    %9 = vector.broadcast %cst : f32 to vector<2x128xf32>
    %10 = arith.maximumf %3, %9 : vector<2x128xf32>
    %cst_9 = arith.constant 0.000000e+00 : f32
    %11 = vector.broadcast %cst_9 : f32 to vector<2x128xf32>
    %12 = arith.minimumf %3, %11 : vector<2x128xf32>
    %cst_10 = arith.constant 5.000000e-01 : f32
    %13 = vector.broadcast %cst_10 : f32 to vector<2x128xf32>
    %14 = arith.mulf %13, %3 : vector<2x128xf32>
    %15 = math.tanh %14 : vector<2x128xf32>
    %cst_11 = arith.constant 2.000000e+00 : f32
    %16 = vector.broadcast %cst_11 : f32 to vector<2x128xf32>
    %17 = arith.mulf %16, %15 : vector<2x128xf32>
    %18 = arith.mulf %15, %15 : vector<2x128xf32>
    %cst_12 = arith.constant 1.000000e+00 : f32
    %19 = vector.broadcast %cst_12 : f32 to vector<2x128xf32>
    %20 = arith.addf %19, %18 : vector<2x128xf32>
    %21 = tpu.reciprocal %20 : vector<2x128xf32> -> vector<2x128xf32>
    %22 = arith.mulf %17, %21 : vector<2x128xf32>
    %23 = vector.broadcast %4 : vector<1x128xf32> to vector<2x128xf32>
    %24 = arith.mulf %23, %10 : vector<2x128xf32>
    %25 = vector.broadcast %5 : vector<1x128xf32> to vector<2x128xf32>
    %26 = arith.mulf %25, %12 : vector<2x128xf32>
    %27 = arith.addf %24, %26 : vector<2x128xf32>
    %28 = vector.broadcast %6 : vector<1x128xf32> to vector<2x128xf32>
    %29 = arith.mulf %28, %15 : vector<2x128xf32>
    %30 = arith.addf %27, %29 : vector<2x128xf32>
    %31 = vector.broadcast %7 : vector<1x128xf32> to vector<2x128xf32>
    %32 = arith.mulf %31, %22 : vector<2x128xf32>
    %33 = arith.addf %30, %32 : vector<2x128xf32>
    %34 = vector.broadcast %8 : vector<1x128xf32> to vector<2x128xf32>
    %35 = arith.addf %33, %34 : vector<2x128xf32>
    %c5 = arith.constant 5 : index
    %c0_13 = arith.constant 0 : index
    %36 = vector.load %arg3[%c5, %c0_13] : memref<15x128xf32, #tpu.memory_space<vmem>>, vector<1x128xf32>
    %c6 = arith.constant 6 : index
    %c0_14 = arith.constant 0 : index
    %37 = vector.load %arg3[%c6, %c0_14] : memref<15x128xf32, #tpu.memory_space<vmem>>, vector<1x128xf32>
    %c7 = arith.constant 7 : index
    %c0_15 = arith.constant 0 : index
    %38 = vector.load %arg3[%c7, %c0_15] : memref<15x128xf32, #tpu.memory_space<vmem>>, vector<1x128xf32>
    %c8 = arith.constant 8 : index
    %c0_16 = arith.constant 0 : index
    %39 = vector.load %arg3[%c8, %c0_16] : memref<15x128xf32, #tpu.memory_space<vmem>>, vector<1x128xf32>
    %c9 = arith.constant 9 : index
    %c0_17 = arith.constant 0 : index
    %40 = vector.load %arg3[%c9, %c0_17] : memref<15x128xf32, #tpu.memory_space<vmem>>, vector<1x128xf32>
    %cst_18 = arith.constant 0.000000e+00 : f32
    %41 = vector.broadcast %cst_18 : f32 to vector<2x128xf32>
    %42 = arith.maximumf %35, %41 : vector<2x128xf32>
    %cst_19 = arith.constant 0.000000e+00 : f32
    %43 = vector.broadcast %cst_19 : f32 to vector<2x128xf32>
    %44 = arith.minimumf %35, %43 : vector<2x128xf32>
    %cst_20 = arith.constant 5.000000e-01 : f32
    %45 = vector.broadcast %cst_20 : f32 to vector<2x128xf32>
    %46 = arith.mulf %45, %35 : vector<2x128xf32>
    %47 = math.tanh %46 : vector<2x128xf32>
    %cst_21 = arith.constant 2.000000e+00 : f32
    %48 = vector.broadcast %cst_21 : f32 to vector<2x128xf32>
    %49 = arith.mulf %48, %47 : vector<2x128xf32>
    %50 = arith.mulf %47, %47 : vector<2x128xf32>
    %cst_22 = arith.constant 1.000000e+00 : f32
    %51 = vector.broadcast %cst_22 : f32 to vector<2x128xf32>
    %52 = arith.addf %51, %50 : vector<2x128xf32>
    %53 = tpu.reciprocal %52 : vector<2x128xf32> -> vector<2x128xf32>
    %54 = arith.mulf %49, %53 : vector<2x128xf32>
    %55 = vector.broadcast %36 : vector<1x128xf32> to vector<2x128xf32>
    %56 = arith.mulf %55, %42 : vector<2x128xf32>
    %57 = vector.broadcast %37 : vector<1x128xf32> to vector<2x128xf32>
    %58 = arith.mulf %57, %44 : vector<2x128xf32>
    %59 = arith.addf %56, %58 : vector<2x128xf32>
    %60 = vector.broadcast %38 : vector<1x128xf32> to vector<2x128xf32>
    %61 = arith.mulf %60, %47 : vector<2x128xf32>
    %62 = arith.addf %59, %61 : vector<2x128xf32>
    %63 = vector.broadcast %39 : vector<1x128xf32> to vector<2x128xf32>
    %64 = arith.mulf %63, %54 : vector<2x128xf32>
    %65 = arith.addf %62, %64 : vector<2x128xf32>
    %66 = vector.broadcast %40 : vector<1x128xf32> to vector<2x128xf32>
    %67 = arith.addf %65, %66 : vector<2x128xf32>
    %c10 = arith.constant 10 : index
    %c0_23 = arith.constant 0 : index
    %68 = vector.load %arg3[%c10, %c0_23] : memref<15x128xf32, #tpu.memory_space<vmem>>, vector<1x128xf32>
    %c11 = arith.constant 11 : index
    %c0_24 = arith.constant 0 : index
    %69 = vector.load %arg3[%c11, %c0_24] : memref<15x128xf32, #tpu.memory_space<vmem>>, vector<1x128xf32>
    %c12 = arith.constant 12 : index
    %c0_25 = arith.constant 0 : index
    %70 = vector.load %arg3[%c12, %c0_25] : memref<15x128xf32, #tpu.memory_space<vmem>>, vector<1x128xf32>
    %c13 = arith.constant 13 : index
    %c0_26 = arith.constant 0 : index
    %71 = vector.load %arg3[%c13, %c0_26] : memref<15x128xf32, #tpu.memory_space<vmem>>, vector<1x128xf32>
    %c14 = arith.constant 14 : index
    %c0_27 = arith.constant 0 : index
    %72 = vector.load %arg3[%c14, %c0_27] : memref<15x128xf32, #tpu.memory_space<vmem>>, vector<1x128xf32>
    %cst_28 = arith.constant 0.000000e+00 : f32
    %73 = vector.broadcast %cst_28 : f32 to vector<2x128xf32>
    %74 = arith.maximumf %67, %73 : vector<2x128xf32>
    %cst_29 = arith.constant 0.000000e+00 : f32
    %75 = vector.broadcast %cst_29 : f32 to vector<2x128xf32>
    %76 = arith.minimumf %67, %75 : vector<2x128xf32>
    %cst_30 = arith.constant 5.000000e-01 : f32
    %77 = vector.broadcast %cst_30 : f32 to vector<2x128xf32>
    %78 = arith.mulf %77, %67 : vector<2x128xf32>
    %79 = math.tanh %78 : vector<2x128xf32>
    %cst_31 = arith.constant 2.000000e+00 : f32
    %80 = vector.broadcast %cst_31 : f32 to vector<2x128xf32>
    %81 = arith.mulf %80, %79 : vector<2x128xf32>
    %82 = arith.mulf %79, %79 : vector<2x128xf32>
    %cst_32 = arith.constant 1.000000e+00 : f32
    %83 = vector.broadcast %cst_32 : f32 to vector<2x128xf32>
    %84 = arith.addf %83, %82 : vector<2x128xf32>
    %85 = tpu.reciprocal %84 : vector<2x128xf32> -> vector<2x128xf32>
    %86 = arith.mulf %81, %85 : vector<2x128xf32>
    %87 = vector.broadcast %68 : vector<1x128xf32> to vector<2x128xf32>
    %88 = arith.mulf %87, %74 : vector<2x128xf32>
    %89 = vector.broadcast %69 : vector<1x128xf32> to vector<2x128xf32>
    %90 = arith.mulf %89, %76 : vector<2x128xf32>
    %91 = arith.addf %88, %90 : vector<2x128xf32>
    %92 = vector.broadcast %70 : vector<1x128xf32> to vector<2x128xf32>
    %93 = arith.mulf %92, %79 : vector<2x128xf32>
    %94 = arith.addf %91, %93 : vector<2x128xf32>
    %95 = vector.broadcast %71 : vector<1x128xf32> to vector<2x128xf32>
    %96 = arith.mulf %95, %86 : vector<2x128xf32>
    %97 = arith.addf %94, %96 : vector<2x128xf32>
    %98 = vector.broadcast %72 : vector<1x128xf32> to vector<2x128xf32>
    %99 = arith.addf %97, %98 : vector<2x128xf32>
    %c0_33 = arith.constant 0 : index
    %c0_34 = arith.constant 0 : index
    %100 = vector.load %arg4[%c0_33, %c0_34] : memref<128x64xf32, #tpu.memory_space<vmem>>, vector<128x64xf32>
    %cst_35 = arith.constant dense<0.000000e+00> : vector<2x64xf32>
    %101 = tpu.matmul %99, %100, %cst_35 {dimension_numbers = #tpu.dot_dimension_numbers<[1], [0], [0], [1], [0, 0, 1, 1], [], []>} : vector<2x128xf32>, vector<128x64xf32>, vector<2x64xf32> -> vector<2x64xf32>
    %c0_36 = arith.constant 0 : index
    %c0_37 = arith.constant 0 : index
    %102 = vector.load %arg5[%c0_36, %c0_37] : memref<1x64xf32, #tpu.memory_space<vmem>>, vector<1x64xf32>
    %103 = vector.broadcast %102 : vector<1x64xf32> to vector<2x64xf32>
    %104 = arith.addf %101, %103 : vector<2x64xf32>
    %c0_38 = arith.constant 0 : index
    %c0_39 = arith.constant 0 : index
    %105 = vector.load %arg6[%c0_38, %c0_39] : memref<2x64xf32, #tpu.memory_space<vmem>>, vector<2x64xf32>
    tpu.vector_store %arg6[%c0_38, %c0_39], %104 {strides = array<i32>} : memref<2x64xf32, #tpu.memory_space<vmem>>, vector<2x64xf32>,
    return
  }
  func.func @transform_0(%arg0: i32) -> (i32, i32) {
    %c0_i32 = arith.constant 0 : i32
    %c0_i32_0 = arith.constant 0 : i32
    return %arg0, %c0_i32 : i32, i32
  }
  func.func @transform_1(%arg0: i32) -> (i32, i32) {
    %c0_i32 = arith.constant 0 : i32
    %c0_i32_0 = arith.constant 0 : i32
    %c0_i32_1 = arith.constant 0 : i32
    return %c0_i32, %c0_i32_0 : i32, i32
  }
  func.func @transform_2(%arg0: i32) -> (i32, i32) {
    %c0_i32 = arith.constant 0 : i32
    %c0_i32_0 = arith.constant 0 : i32
    %c0_i32_1 = arith.constant 0 : i32
    return %c0_i32, %c0_i32_0 : i32, i32
  }
  func.func @transform_3(%arg0: i32) -> (i32, i32) {
    %c0_i32 = arith.constant 0 : i32
    %c0_i32_0 = arith.constant 0 : i32
    %c0_i32_1 = arith.constant 0 : i32
    return %c0_i32, %c0_i32_0 : i32, i32
  }
  func.func @transform_4(%arg0: i32) -> (i32, i32) {
    %c0_i32 = arith.constant 0 : i32
    %c0_i32_0 = arith.constant 0 : i32
    %c0_i32_1 = arith.constant 0 : i32
    return %c0_i32, %c0_i32_0 : i32, i32
  }
  func.func @transform_5(%arg0: i32) -> (i32, i32) {
    %c0_i32 = arith.constant 0 : i32
    %c0_i32_0 = arith.constant 0 : i32
    return %arg0, %c0_i32 : i32, i32
  }
}

</mosaic_0001>

<bundles_post_ra>
// kernel: tpu_custom_call.1
= control target key start
LH: loop header
LB: loop body
LE: loop exit
PB: predicated region body
PF: predicated region fallthrough
CT: control target
= control target key end

     0   :  { %v398_v3 = vmov 0.0|0.0   ;;  %vm399_vm0 = vmmov 0   ;;  %v400_v6 = vmov 0.0   ;;  %s546_s0 = inlined_call_operand.vmem [shape: f32[2,128], index: 0, kind: input, shape index: {}]   ;;  %s547_s1 = inlined_call_operand.vmem [shape: f32[1,128], index: 1, kind: input, shape index: {}]   ;;  %s548_s2 = inlined_call_operand.vmem [shape: f32[15,128], index: 2, kind: input, shape index: {}]   ;;  %s549_s3 = inlined_call_operand.vmem [shape: f32[128,64], index: 3, kind: input, shape index: {}]   ;;  %s550_s4 = inlined_call_operand.vmem [shape: f32[1,64], index: 4, kind: input, shape index: {}]   ;;  %s551_s5 = inlined_call_operand.hbm [shape: f32[2,64], index: 5, kind: output, shape index: {}]  }
   0x1   :  { %v156_v0 = vld [vmem:[%s549_s3] sm:$0xff]  ;;  %v157_v1 = vld [vmem:[%s549_s3 + $0x8] sm:$0xff]  ;;  %v158_v2 = vld [vmem:[%s549_s3 + $0x10] sm:$0xff]  ;;  %334 = vmatprep.subr.bf16.mxu0 %v398_v3  ;;  %331 = vmatprep.mubr.msk.f32.mxu0 %vm399_vm0, %v400_v6 }
   0x2   :  { %v335_v4 = vpack.c.bf16 %v157_v1, %v156_v0  ;;  %v159_v5 = vld [vmem:[%s549_s3 + $0x18] sm:$0xff]  ;;  %v160_v8 = vld [vmem:[%s549_s3 + $0x20] sm:$0xff]  ;;  %v161_v9 = vld [vmem:[%s549_s3 + $0x28] sm:$0xff] }
   0x3   :  { %v338_v7 = vpack.c.bf16 %v159_v5, %v158_v2  ;;  %v21_v10 = vld [vmem:[%s546_s0] sm:$0x3]  ;;  %v341_v13 = vpack.c.bf16 %v161_v9, %v160_v8  ;;  %v162_v14 = vld [vmem:[%s549_s3 + $0x30] sm:$0xff]  ;;  %v163_v15 = vld [vmem:[%s549_s3 + $0x38] sm:$0xff] }
   0x4   :  { %336 = vmatpush3.bf16.msra.mxu0 %v335_v4  ;;  %v265_v11 = vld [vmem:[%s547_s1] ss:$0 sm:$0xff]  ;;  %v344_v17 = vpack.c.bf16 %v163_v15, %v162_v14  ;;  %v165_v19 = vld [vmem:[%s549_s3 + $0x48] sm:$0xff] }
   0x5   :  { %337 = vmatprep.subr.bf16.mxu0 %v398_v3  ;;  %v29_v12 = vmul.f32 %v265_v11, %v21_v10  ;;  %v164_v18 = vld [vmem:[%s549_s3 + $0x40] sm:$0xff] }
   0x7   :  { %v37_v16 = vmul.f32 0.5, %v29_v12 }
   0x8   :  { %339 = vmatpush3.bf16.msra.mxu0 %v338_v7 }
   0x9   :  { %340 = vmatprep.subr.bf16.mxu0 %v398_v3  ;;  %362 = vtanh.f32 %v37_v16 }
   0xc   :  { %342 = vmatpush3.bf16.msra.mxu0 %v341_v13 }
   0xd   :  { %343 = vmatprep.subr.bf16.mxu0 %v398_v3 }
   0xe   :  { %10 = vsyncpa [#allocation3], 0  ;;  %v347_v20 = vpack.c.bf16 %v165_v19, %v164_v18  ;;  %v166_v21 = vld [vmem:[%s549_s3 + $0x50] sm:$0xff]  ;;  %v167_v22 = vld [vmem:[%s549_s3 + $0x58] sm:$0xff]  ;;  %v35_v32 = vmax.f32 %v29_v12, 0.0  ;;  %v36_v33 = vmin.f32 %v29_v12, 0.0 }
   0xf   :  { %v350_v23 = vpack.c.bf16 %v167_v22, %v166_v21  ;;  %v168_v25 = vld [vmem:[%s549_s3 + $0x60] sm:$0xff]  ;;  %v169_v26 = vld [vmem:[%s549_s3 + $0x68] sm:$0xff]  ;;  %v170_v30 = vld [vmem:[%s549_s3 + $0x70] sm:$0xff]  ;;  %s401_s6 = smov [#allocation2]   ;;  %vm249_vm1 = vcmask 517120  }
  0x10   :  { %345 = vmatpush3.bf16.msra.mxu0 %v344_v17  ;;  %v353_v28 = vpack.c.bf16 %v169_v26, %v168_v25  ;;  %v171_v31 = vld [vmem:[%s549_s3 + $0x78] sm:$0xff]  ;;  %v266_v34 = vld [vmem:[%s548_s2] ss:$0 sm:$0xff]  ;;  %v267_v35 = vld [vmem:[%s548_s2 + $0x1] ss:$0 sm:$0xff]  ;;  %s257_s7 = sshll.u32 %s401_s6, 4  ;;  %s258_s7 = int_to_ptr.vmem [resolvable:$true] %s257_s7 }
  0x11   :  { %346 = vmatprep.subr.bf16.mxu0 %v398_v3  ;;  %v356_v36 = vpack.c.bf16 %v171_v31, %v170_v30  ;;  %v48_v37 = vmul.f32 %v266_v34, %v35_v32  ;;  %v53_v38 = vmul.f32 %v267_v35, %v36_v33  ;;  %v268_v39 = vld [vmem:[%s548_s2 + $0x2] ss:$0 sm:$0xff]  ;;  %v269_v44 = vld [vmem:[%s548_s2 + $0x3] ss:$0 sm:$0xff]  ;;  %v270_v48 = vld [vmem:[%s548_s2 + $0x4] ss:$0 sm:$0xff]  ;;  %p379_p1 = scmp.lt.s32.totalorder %s258_s7, %s258_s7 }
  0x12   :  { %v271_v57 = vld [vmem:[%s548_s2 + $0x5] ss:$0 sm:$0xff]  ;;  %v272_v58 = vld [vmem:[%s548_s2 + $0x6] ss:$0 sm:$0xff]  ;;  %v273_v61 = vld [vmem:[%s548_s2 + $0x7] ss:$0 sm:$0xff] }
  0x13   :  { %v363_v24 = vpop.eup %362  ;;  %v54_v41 = vadd.f32 %v53_v38, %v48_v37  ;;  %v274_v2 = vld [vmem:[%s548_s2 + $0x8] ss:$0 sm:$0xff]  ;;  %v275_v6 = vld [vmem:[%s548_s2 + $0x9] ss:$0 sm:$0xff]  ;;  %v276_v15 = vld [vmem:[%s548_s2 + $0xa] ss:$0 sm:$0xff] }
  0x14   :  { %348 = vmatpush3.bf16.msra.mxu0 %v347_v20  ;;  %v40_v27 = vmul.f32 %v363_v24, %v363_v24  ;;  %v39_v40 = vmul.f32 2.0, %v363_v24  ;;  %v59_v42 = vmul.f32 %v363_v24, %v268_v39  ;;  %v277_v16 = vld [vmem:[%s548_s2 + $0xb] ss:$0 sm:$0xff]  ;;  %v278_v19 = vld [vmem:[%s548_s2 + $0xc] ss:$0 sm:$0xff]  ;;  %s374_s3 = scalar_lea.vmem %s258_s7, 32 }
  0x15   :  { %349 = vmatprep.subr.bf16.mxu0 %v398_v3  ;;  %v279_v24 = vld [vmem:[%s548_s2 + $0xd] ss:$0 sm:$0xff]  ;;  %v281_v31 = vld [vmem:[%s550_s4] ss:$0 sm:$0xff]  ;;  %p375_p0 = scmp.ne.s32.totalorder %s258_s7, %s374_s3  ;;  %p380_p2 = scmp.lt.s32.totalorder %s374_s3, %s374_s3 }
  0x16   :  { %v41_v29 = vadd.f32 1.0, %v40_v27  ;;  %v60_v46 = vadd.f32 %v59_v42, %v54_v41 }
  0x17   :  { %p381_p3 = por %p380_p2, %p379_p1 }
  0x18   :  { %351 = vmatpush3.bf16.msra.mxu0 %v350_v23  ;;  %364 = vrcp.f32 %v41_v29 }
  0x19   :  { %352 = vmatprep.subr.bf16.mxu0 %v398_v3  ;;  %p382_p4 = pnand %p381_p3, %p375_p0 }
  0x1c   :  { %354 = vmatpush3.bf16.msra.mxu0 %v353_v28  ;;  %v280_v28 = vld [vmem:[%s548_s2 + $0xe] ss:$0 sm:$0xff] }
  0x1d   :  { %355 = vmatprep.subr.bf16.mxu0 %v398_v3 }
  0x20   :  { %357 = vmatpush3.bf16.msra.mxu0 %v356_v36 }
  0x22   :  { %v365_v43 = vpop.eup %364 }
  0x23   :  { %v43_v45 = vmul.f32 %v365_v43, %v39_v40 }
  0x25   :  { %v65_v47 = vmul.f32 %v269_v44, %v43_v45 }
  0x27   :  { %v66_v49 = vadd.f32 %v65_v47, %v60_v46 }
  0x29   :  { %v71_v50 = vadd.f32 %v270_v48, %v66_v49 }
  0x2b   :  { %v79_v51 = vmul.f32 0.5, %v71_v50  ;;  %v77_v55 = vmax.f32 %v71_v50, 0.0  ;;  %v78_v56 = vmin.f32 %v71_v50, 0.0 }
  0x2d   :  { %366 = vtanh.f32 %v79_v51  ;;  %v90_v59 = vmul.f32 %v271_v57, %v77_v55  ;;  %v95_v60 = vmul.f32 %v272_v58, %v78_v56 }
  0x2f   :  { %v96_v63 = vadd.f32 %v95_v60, %v90_v59 }
  0x37   :  { %v367_v52 = vpop.eup %366 }
  0x38   :  { %v82_v53 = vmul.f32 %v367_v52, %v367_v52  ;;  %v81_v62 = vmul.f32 2.0, %v367_v52  ;;  %v101_v0 = vmul.f32 %v367_v52, %v273_v61 }
  0x3a   :  { %v83_v54 = vadd.f32 1.0, %v82_v53  ;;  %v102_v4 = vadd.f32 %v101_v0, %v96_v63 }
  0x3c   :  { %368 = vrcp.f32 %v83_v54 }
  0x46   :  { %v369_v1 = vpop.eup %368 }
  0x47   :  { %v85_v3 = vmul.f32 %v369_v1, %v81_v62 }
  0x49   :  { %v107_v5 = vmul.f32 %v274_v2, %v85_v3 }
  0x4b   :  { %v108_v7 = vadd.f32 %v107_v5, %v102_v4 }
  0x4d   :  { %v113_v8 = vadd.f32 %v275_v6, %v108_v7 }
  0x4f   :  { %v121_v9 = vmul.f32 0.5, %v113_v8  ;;  %v119_v13 = vmax.f32 %v113_v8, 0.0  ;;  %v120_v14 = vmin.f32 %v113_v8, 0.0 }
  0x51   :  { %370 = vtanh.f32 %v121_v9  ;;  %v132_v17 = vmul.f32 %v276_v15, %v119_v13  ;;  %v137_v18 = vmul.f32 %v277_v16, %v120_v14 }
  0x53   :  { %v138_v21 = vadd.f32 %v137_v18, %v132_v17 }
  0x5b   :  { %v371_v10 = vpop.eup %370 }
  0x5c   :  { %v124_v11 = vmul.f32 %v371_v10, %v371_v10  ;;  %v123_v20 = vmul.f32 2.0, %v371_v10  ;;  %v143_v22 = vmul.f32 %v371_v10, %v278_v19 }
  0x5e   :  { %v125_v12 = vadd.f32 1.0, %v124_v11  ;;  %v144_v26 = vadd.f32 %v143_v22, %v138_v21 }
  0x60   :  { %372 = vrcp.f32 %v125_v12 }
  0x6a   :  { %v373_v23 = vpop.eup %372 }
  0x6b   :  { %v127_v25 = vmul.f32 %v373_v23, %v123_v20 }
  0x6d   :  { %v149_v27 = vmul.f32 %v279_v24, %v127_v25 }
  0x6f   :  { %v150_v29 = vadd.f32 %v149_v27, %v144_v26 }
  0x71   :  { %v155_v30 = vadd.f32 %v280_v28, %v150_v29 }
  0x73   :  { %332 = vmatmul.mubr.f32.vlgmr.msra.gmra.mrb[0].mxu0 %v155_v30 }
 0x146   :  { %v245_v32 = vpop.f32.mrb[0].mxu0 }
 0x147   :  { %v246_v33 = vadd.f32 %v281_v31, %v245_v32  ;;  %v333_v34 = vpop.f32.mrb[1].mxu0 }
 0x149   :  { %250 = vst.msk [vmem:[#allocation2] sm:$0x3] %vm249_vm1, %v246_v33 }
 0x14a   :  { %385 = shalt.err (!%p382_p4)
}
 0x14b   :  { %s386_s9 = scalar_lea.hbm %s551_s5, 32 }
 0x14c   :  { %p387_p5 = scmp.ne.s32.totalorder %s551_s5, %s386_s9  ;;  %p390_p6 = scmp.lt.u32.totalorder %s386_s9, %s551_s5 }
 0x14e   :  { %p392_p7 = pnand %p390_p6, %p387_p5 }
 0x150   :  { %395 = shalt.err (!%p392_p7)
}
 0x151   :  { %260 = dma.vmem_to_hbm [thread:$0]  %s258_s7, 32, %s551_s5, [#allocation3]  }
 0x152   :  { %396 = dma.done.wait [#allocation3], 32  }
 0x153   :  { %397 = vsyncadd [#allocation3], 4294967264 }
 0x154   :  { %264 = vsyncpa [#allocation3], 1 }

</bundles_post_ra>
